<compile_context>
chip_gen: v5e
topology: v5e:2x2
jax: 0.10.0
libtpu: 0.0.40
codegen_flags: <defaults>
</compile_context>

<pallas_src>
import functools

import jax
import jax.numpy as jnp
from jax.experimental import pallas as pl
from jax.experimental.pallas import tpu as pltpu

LANE = 128          # lane width: last block dim must be a multiple of this
SUBLANE = 8         # sublane granularity for the second-to-last block dim
LANE_TARGET = 256   # fills the 256-wide MXU on v6e/v7x; harmless on v5e


def _round_up(n, m):
    return ((n + m - 1) // m) * m


def _cdiv(a, b):
    return -(-a // b)


def bp_kernel(x_ref, w_ref, b_ref, o_ref):
    """One composed linear layer applied to a (TM, Dp) packed activation tile.

    x_ref: (TM, Dp)  packed activation tile (pipelined over the row grid)
    w_ref: (Dp, Dp)  block-diagonal composed weight (VMEM-resident)
    b_ref: (1, Dp)   tiled composed bias            (VMEM-resident)
    o_ref: (TM, Dp)  output tile
    """
    acc = jnp.dot(x_ref[...], w_ref[...], preferred_element_type=jnp.float32)
    o_ref[...] = (acc + b_ref[...]).astype(o_ref.dtype)


def prepare_params(weights, biases, lane_target=LANE_TARGET):
    """One-time parameter prep (call OUTSIDE the hot path).

    1. Composes the L torch-style layers y = x @ W_i^T + b_i into a single
       effective map y = x @ Wt_eff + b_eff (valid because bp_n has no
       nonlinearity between layers).
    2. Lane-packs: if lane_target (or 128) is a multiple of D, G = target/D
       tokens share one row and Wt_eff is replicated block-diagonally so no
       lane of the activation DMA is wasted.  Otherwise D is zero-padded up
       to a multiple of 128 (G = 1).

    Returns (w_packed (Dp,Dp) f32, b_packed (1,Dp) f32, group G).
    """
    num_layers, d_out, d_in = weights.shape
    assert d_out == d_in, "bp_n uses square Linear layers"
    D = d_in
    hi = jax.lax.Precision.HIGHEST

    wt_eff = jnp.transpose(weights[0]).astype(jnp.float32)        # W_1^T
    b_eff = biases[0].astype(jnp.float32)
    for i in range(1, num_layers):
        wt_i = jnp.transpose(weights[i]).astype(jnp.float32)      # W_i^T
        wt_eff = jnp.matmul(wt_eff, wt_i, precision=hi)
        b_eff = jnp.matmul(b_eff, wt_i, precision=hi) + biases[i].astype(jnp.float32)

    if lane_target % D == 0:
        group, dp = lane_target // D, lane_target
    elif LANE % D == 0:
        group, dp = LANE // D, LANE
    else:
        group, dp = 1, _round_up(D, LANE)

    w_p = jnp.zeros((dp, dp), jnp.float32)
    b_p = jnp.zeros((dp,), jnp.float32)
    for g in range(group):
        w_p = w_p.at[g * D:(g + 1) * D, g * D:(g + 1) * D].set(wt_eff)
        b_p = b_p.at[g * D:(g + 1) * D].set(b_eff)
    return w_p, b_p.reshape(1, dp), group


def _vmem_capacity_bytes():
    try:
        return int(pltpu.get_tpu_info().vmem_capacity_bytes)
    except Exception:
        return 64 << 20          # conservative fallback (v7x per-TC VMEM)


@functools.partial(jax.jit, static_argnames=("group", "tm"))
def bp_n_forward(x, w_packed, b_packed, *, group=1, tm=2048):
    """Forward pass. `w_packed`, `b_packed`, `group` come from prepare_params."""
    B, S, D = x.shape
    Dp = w_packed.shape[0]
    G = group
    M = B * S
    row_width = G * D                       # real lanes per packed row (<= Dp)

    # ---- tiling: tile count first, tile size derived from it ---------------
    rows = _cdiv(M, G)                      # packed rows of real data
    grid_m = max(1, _cdiv(rows, tm))
    if grid_m == 1 and rows >= 2 * SUBLANE:
        grid_m = 2                          # keep both v7x TensorCores busy
    TM = _round_up(_cdiv(rows, grid_m), SUBLANE)

    # ---- generation-aware VMEM budget (actual element sizes) ---------------
    cap = _vmem_capacity_bytes()
    budget = min(int(cap * 0.9), 120 << 20)
    itemsize = jnp.dtype(x.dtype).itemsize
    resident = (w_packed.size * w_packed.dtype.itemsize
                + b_packed.size * b_packed.dtype.itemsize)

    def _needed(tm_rows):
        # resident params + double-buffered input and output tiles
        return resident + 2 * tm_rows * Dp * itemsize * 2

    while _needed(TM) > budget and TM > SUBLANE:
        TM = _round_up(TM // 2, SUBLANE)
    # TODO(synk): for very large d_model where the composed (Dp, Dp) weight
    # alone exceeds VMEM, switch to a K-streamed weight grid instead.

    grid_m = _cdiv(rows, TM)
    rows_p = grid_m * TM
    vmem_limit = int(min(budget, max(_needed(TM) + (2 << 20), 16 << 20)))

    # ---- pack tokens into lane-dense rows -----------------------------------
    x2 = x.reshape(M, D)
    tok_pad = rows_p * G
    x2 = jnp.pad(x2, ((0, tok_pad - M), (0, 0)))
    xr = x2.reshape(rows_p, row_width)
    xr = jnp.pad(xr, ((0, 0), (0, Dp - row_width)))

    out = pl.pallas_call(
        bp_kernel,
        out_shape=jax.ShapeDtypeStruct((rows_p, Dp), x.dtype),
        grid=(grid_m,),
        in_specs=[
            pl.BlockSpec((TM, Dp), lambda i: (i, 0)),   # activation tile
            pl.BlockSpec((Dp, Dp), lambda i: (0, 0)),   # composed weight: resident
            pl.BlockSpec((1, Dp), lambda i: (0, 0)),    # composed bias:   resident
        ],
        out_specs=pl.BlockSpec((TM, Dp), lambda i: (i, 0)),
        compiler_params=pltpu.CompilerParams(
            dimension_semantics=("parallel",),
            vmem_limit_bytes=vmem_limit,
        ),
    )(xr, w_packed, b_packed)

    # ---- unpack --------------------------------------------------------------
    out = out[:, :row_width].reshape(rows_p * G, D)[:M]
    return out.reshape(B, S, D)


def bp_n_reference(x, weights, biases):
    """Plain-JAX reference mirroring the PyTorch forward (x @ W_i^T + b_i)."""
    h = x
    for i in range(weights.shape[0]):
        h = jnp.einsum("bsd,od->bso", h, weights[i]) + biases[i]
    return h


if __name__ == "__main__":
    # Small shapes consistent with the module: configs.e_layers=3, d_model=32.
    B, S, D, L = 2, 8, 32, 3

    key = jax.random.PRNGKey(0)
    kx, kw, kb = jax.random.split(key, 3)

    x = jax.random.normal(kx, (B, S, D), dtype=jnp.float32)

    # Deterministic init mimicking nn.Linear default: U(-1/sqrt(D), 1/sqrt(D)).
    bound = 1.0 / jnp.sqrt(jnp.float32(D))
    weights = jax.random.uniform(kw, (L, D, D), jnp.float32, -bound, bound)
    biases = jax.random.uniform(kb, (L, D), jnp.float32, -bound, bound)

    # One-time parameter composition + lane-packing (hoisted out of hot path).
    w_p, b_p, G = prepare_params(weights, biases)
    w_p, b_p = jax.block_until_ready((w_p, b_p))

    out = bp_n_forward(x, w_p, b_p, group=G)
    out = jax.block_until_ready(out)

    ref = bp_n_reference(x, weights, biases)
    assert out.shape == (B, S, D)
    assert jnp.allclose(out, ref, atol=1e-4, rtol=1e-4), "mismatch vs reference"

    print("KERNEL_OK")
</pallas_src>

<mosaic_0001>
module attributes {stable_mosaic.version = 11 : i64} {
  func.func @bp_kernel(%arg0: i32, %arg1: memref<8x256xf32, #tpu.memory_space<vmem>>, %arg2: memref<256x256xf32, #tpu.memory_space<vmem>>, %arg3: memref<1x256xf32, #tpu.memory_space<vmem>>, %arg4: memref<8x256xf32, #tpu.memory_space<vmem>>) attributes {dimension_semantics = [#tpu.dimension_semantics<parallel>], iteration_bounds = array<i64: 1>, scalar_prefetch = 0 : i64, scratch_operands = 0 : i64, tpu.core_type = #tpu.core_type<tc>, window_params = [{transform_indices = @transform_0, window_bounds = array<i64: 8, 256>}, {pipeline_mode = #tpu.pipeline_mode<synchronous>, transform_indices = @transform_1, window_bounds = array<i64: 256, 256>}, {pipeline_mode = #tpu.pipeline_mode<synchronous>, transform_indices = @transform_2, window_bounds = array<i64: 1, 256>}, {transform_indices = @transform_3, window_bounds = array<i64: 8, 256>}]} {
    %c0 = arith.constant 0 : index
    %c0_0 = arith.constant 0 : index
    %0 = vector.load %arg1[%c0, %c0_0] : memref<8x256xf32, #tpu.memory_space<vmem>>, vector<8x256xf32>
    %c0_1 = arith.constant 0 : index
    %c0_2 = arith.constant 0 : index
    %1 = vector.load %arg2[%c0_1, %c0_2] : memref<256x256xf32, #tpu.memory_space<vmem>>, vector<256x256xf32>
    %cst = arith.constant dense<0.000000e+00> : vector<8x256xf32>
    %2 = tpu.matmul %0, %1, %cst {dimension_numbers = #tpu.dot_dimension_numbers<[1], [0], [0], [1], [0, 0, 1, 1], [], []>} : vector<8x256xf32>, vector<256x256xf32>, vector<8x256xf32> -> vector<8x256xf32>
    %c0_3 = arith.constant 0 : index
    %c0_4 = arith.constant 0 : index
    %3 = vector.load %arg3[%c0_3, %c0_4] : memref<1x256xf32, #tpu.memory_space<vmem>>, vector<1x256xf32>
    %4 = vector.broadcast %3 : vector<1x256xf32> to vector<8x256xf32>
    %5 = arith.addf %2, %4 : vector<8x256xf32>
    %c0_5 = arith.constant 0 : index
    %c0_6 = arith.constant 0 : index
    %6 = vector.load %arg4[%c0_5, %c0_6] : memref<8x256xf32, #tpu.memory_space<vmem>>, vector<8x256xf32>
    tpu.vector_store %arg4[%c0_5, %c0_6], %5 {strides = array<i32>} : memref<8x256xf32, #tpu.memory_space<vmem>>, vector<8x256xf32>,
    return
  }
  func.func @transform_0(%arg0: i32) -> (i32, i32) {
    %c0_i32 = arith.constant 0 : i32
    %c0_i32_0 = arith.constant 0 : i32
    return %arg0, %c0_i32 : i32, i32
  }
  func.func @transform_1(%arg0: i32) -> (i32, i32) {
    %c0_i32 = arith.constant 0 : i32
    %c0_i32_0 = arith.constant 0 : i32
    %c0_i32_1 = arith.constant 0 : i32
    return %c0_i32, %c0_i32_0 : i32, i32
  }
  func.func @transform_2(%arg0: i32) -> (i32, i32) {
    %c0_i32 = arith.constant 0 : i32
    %c0_i32_0 = arith.constant 0 : i32
    %c0_i32_1 = arith.constant 0 : i32
    return %c0_i32, %c0_i32_0 : i32, i32
  }
  func.func @transform_3(%arg0: i32) -> (i32, i32) {
    %c0_i32 = arith.constant 0 : i32
    %c0_i32_0 = arith.constant 0 : i32
    return %arg0, %c0_i32 : i32, i32
  }
}

</mosaic_0001>

<bundles_post_ra>
// kernel: bp_n_forward.1
= control target key start
LH: loop header
LB: loop body
LE: loop exit
PB: predicated region body
PF: predicated region fallthrough
CT: control target
= control target key end

     0   :  { %8 = vsyncpa [#allocation3], 0  ;;  %s218_s15 = smov [#allocation2]   ;;  %s219_s17 = smov 256   ;;  %s259_s0 = inlined_call_operand.vmem [shape: f32[8,256], index: 0, kind: input, shape index: {}]   ;;  %s260_s1 = inlined_call_operand.hbm [shape: f32[256,256], index: 1, kind: input, shape index: {}]   ;;  %s261_s2 = inlined_call_operand.vmem [shape: f32[1,256], index: 2, kind: input, shape index: {}]   ;;  %s262_s3 = inlined_call_operand.vmem [shape: f32[8,256], index: 3, kind: output, shape index: {}]  }
   0x1   :  { %s15_s14 = sshll.u32 %s260_s1, 4  ;;  %s17_s16 = sshll.u32 %s218_s15, 4  ;;  %s16_s14 = int_to_ptr.hbm [resolvable:$true] %s15_s14  ;;  %s18_s16 = int_to_ptr.vmem [resolvable:$true] %s17_s16 }
   0x2   :  { %s220_s18 = smov 16  }
   0x3   :  { %23 = dma.hbm_to_vmem [thread:$0]  %s16_s14, 8192, %s18_s16, [#allocation3], %s219_s17, %s219_s17, %s220_s18  }
   0x4   :  { %216 = dma.done.wait [#allocation3], 8192  }
   0x5   :  { %217 = vsyncadd [#allocation3], 4294959104  ;;  %v63_v0 = vld [vmem:[#allocation2 + $0xf8] sm:$0xff]  ;;  %v61_v1 = vld [vmem:[#allocation2 + $0xe8] sm:$0xff] }
   0x6   :  { %v95_v2 = vld [vmem:[#allocation2 + $0x1f8] sm:$0xff]  ;;  %142 = vmatpush.msra.mxu2 %v63_v0  ;;  %v93_v3 = vld [vmem:[#allocation2 + $0x1e8] sm:$0xff]  ;;  %v62_v4 = vld [vmem:[#allocation2 + $0xf0] sm:$0xff] }
   0x7   :  { %162 = vmatpush.msra.mxu3 %v95_v2  ;;  %v59_v5 = vld [vmem:[#allocation2 + $0xd8] sm:$0xff]  ;;  %102 = vmatpush.msra.mxu0 %v62_v4  ;;  %v60_v7 = vld [vmem:[#allocation2 + $0xe0] sm:$0xff]  ;;  %v57_v8 = vld [vmem:[#allocation2 + $0xc8] sm:$0xff] }
   0x8   :  { %v91_v6 = vld [vmem:[#allocation2 + $0x1d8] sm:$0xff]  ;;  %143 = vmatpush.msra.mxu2 %v61_v1  ;;  %v94_v9 = vld [vmem:[#allocation2 + $0x1f0] sm:$0xff]  ;;  %v89_v10 = vld [vmem:[#allocation2 + $0x1c8] sm:$0xff] }
   0x9   :  { %163 = vmatpush.msra.mxu3 %v93_v3  ;;  %103 = vmatpush.msra.mxu0 %v60_v7  ;;  %v58_v11 = vld [vmem:[#allocation2 + $0xd0] sm:$0xff]  ;;  %v92_v12 = vld [vmem:[#allocation2 + $0x1e0] sm:$0xff]  ;;  %v55_v15 = vld [vmem:[#allocation2 + $0xb8] sm:$0xff] }
   0xa   :  { %122 = vmatpush.msra.mxu1 %v94_v9  ;;  %144 = vmatpush.msra.mxu2 %v59_v5  ;;  %v56_v13 = vld [vmem:[#allocation2 + $0xc0] sm:$0xff]  ;;  %v90_v14 = vld [vmem:[#allocation2 + $0x1d0] sm:$0xff]  ;;  %v87_v16 = vld [vmem:[#allocation2 + $0x1b8] sm:$0xff] }
   0xb   :  { %164 = vmatpush.msra.mxu3 %v91_v6  ;;  %104 = vmatpush.msra.mxu0 %v58_v11  ;;  %v54_v17 = vld [vmem:[#allocation2 + $0xb0] sm:$0xff]  ;;  %v88_v18 = vld [vmem:[#allocation2 + $0x1c0] sm:$0xff]  ;;  %v53_v19 = vld [vmem:[#allocation2 + $0xa8] sm:$0xff] }
   0xc   :  { %123 = vmatpush.msra.mxu1 %v92_v12  ;;  %145 = vmatpush.msra.mxu2 %v57_v8  ;;  %v85_v20 = vld [vmem:[#allocation2 + $0x1a8] sm:$0xff]  ;;  %v52_v21 = vld [vmem:[#allocation2 + $0xa0] sm:$0xff]  ;;  %v86_v22 = vld [vmem:[#allocation2 + $0x1b0] sm:$0xff] }
   0xd   :  { %165 = vmatpush.msra.mxu3 %v89_v10  ;;  %105 = vmatpush.msra.mxu0 %v56_v13  ;;  %v51_v23 = vld [vmem:[#allocation2 + $0x98] sm:$0xff]  ;;  %v50_v25 = vld [vmem:[#allocation2 + $0x90] sm:$0xff]  ;;  %v84_v26 = vld [vmem:[#allocation2 + $0x1a0] sm:$0xff] }
   0xe   :  { %124 = vmatpush.msra.mxu1 %v90_v14  ;;  %146 = vmatpush.msra.mxu2 %v55_v15  ;;  %v83_v24 = vld [vmem:[#allocation2 + $0x198] sm:$0xff]  ;;  %v49_v27 = vld [vmem:[#allocation2 + $0x88] sm:$0xff]  ;;  %v48_v29 = vld [vmem:[#allocation2 + $0x80] sm:$0xff] }
   0xf   :  { %166 = vmatpush.msra.mxu3 %v87_v16  ;;  %106 = vmatpush.msra.mxu0 %v54_v17  ;;  %v81_v28 = vld [vmem:[#allocation2 + $0x188] sm:$0xff]  ;;  %v82_v30 = vld [vmem:[#allocation2 + $0x190] sm:$0xff]  ;;  %v47_v31 = vld [vmem:[#allocation2 + $0x78] sm:$0xff] }
  0x10   :  { %125 = vmatpush.msra.mxu1 %v88_v18  ;;  %147 = vmatpush.msra.mxu2 %v53_v19  ;;  %v79_v32 = vld [vmem:[#allocation2 + $0x178] sm:$0xff]  ;;  %v46_v33 = vld [vmem:[#allocation2 + $0x70] sm:$0xff]  ;;  %v80_v34 = vld [vmem:[#allocation2 + $0x180] sm:$0xff] }
  0x11   :  { %167 = vmatpush.msra.mxu3 %v85_v20  ;;  %107 = vmatpush.msra.mxu0 %v52_v21  ;;  %v45_v35 = vld [vmem:[#allocation2 + $0x68] sm:$0xff]  ;;  %v44_v37 = vld [vmem:[#allocation2 + $0x60] sm:$0xff]  ;;  %v78_v38 = vld [vmem:[#allocation2 + $0x170] sm:$0xff] }
  0x12   :  { %126 = vmatpush.msra.mxu1 %v86_v22  ;;  %148 = vmatpush.msra.mxu2 %v51_v23  ;;  %v77_v36 = vld [vmem:[#allocation2 + $0x168] sm:$0xff]  ;;  %v43_v39 = vld [vmem:[#allocation2 + $0x58] sm:$0xff]  ;;  %v42_v41 = vld [vmem:[#allocation2 + $0x50] sm:$0xff] }
  0x13   :  { %168 = vmatpush.msra.mxu3 %v83_v24  ;;  %108 = vmatpush.msra.mxu0 %v50_v25  ;;  %v75_v40 = vld [vmem:[#allocation2 + $0x158] sm:$0xff]  ;;  %v76_v42 = vld [vmem:[#allocation2 + $0x160] sm:$0xff]  ;;  %v41_v43 = vld [vmem:[#allocation2 + $0x48] sm:$0xff] }
  0x14   :  { %127 = vmatpush.msra.mxu1 %v84_v26  ;;  %149 = vmatpush.msra.mxu2 %v49_v27  ;;  %v73_v44 = vld [vmem:[#allocation2 + $0x148] sm:$0xff]  ;;  %v40_v45 = vld [vmem:[#allocation2 + $0x40] sm:$0xff]  ;;  %v74_v46 = vld [vmem:[#allocation2 + $0x150] sm:$0xff] }
  0x15   :  { %169 = vmatpush.msra.mxu3 %v81_v28  ;;  %109 = vmatpush.msra.mxu0 %v48_v29  ;;  %v39_v47 = vld [vmem:[#allocation2 + $0x38] sm:$0xff]  ;;  %v38_v49 = vld [vmem:[#allocation2 + $0x30] sm:$0xff]  ;;  %v72_v50 = vld [vmem:[#allocation2 + $0x140] sm:$0xff] }
  0x16   :  { %128 = vmatpush.msra.mxu1 %v82_v30  ;;  %150 = vmatpush.msra.mxu2 %v47_v31  ;;  %v71_v48 = vld [vmem:[#allocation2 + $0x138] sm:$0xff]  ;;  %v37_v51 = vld [vmem:[#allocation2 + $0x28] sm:$0xff]  ;;  %v36_v53 = vld [vmem:[#allocation2 + $0x20] sm:$0xff] }
  0x17   :  { %170 = vmatpush.msra.mxu3 %v79_v32  ;;  %110 = vmatpush.msra.mxu0 %v46_v33  ;;  %v69_v52 = vld [vmem:[#allocation2 + $0x128] sm:$0xff]  ;;  %v70_v54 = vld [vmem:[#allocation2 + $0x130] sm:$0xff]  ;;  %v35_v55 = vld [vmem:[#allocation2 + $0x18] sm:$0xff] }
  0x18   :  { %129 = vmatpush.msra.mxu1 %v80_v34  ;;  %151 = vmatpush.msra.mxu2 %v45_v35  ;;  %v67_v56 = vld [vmem:[#allocation2 + $0x118] sm:$0xff]  ;;  %v34_v57 = vld [vmem:[#allocation2 + $0x10] sm:$0xff]  ;;  %v68_v58 = vld [vmem:[#allocation2 + $0x120] sm:$0xff] }
  0x19   :  { %171 = vmatpush.msra.mxu3 %v77_v36  ;;  %111 = vmatpush.msra.mxu0 %v44_v37  ;;  %v33_v59 = vld [vmem:[#allocation2 + $0x8] sm:$0xff]  ;;  %v30_v61 = vld [vmem:[%s259_s0] sm:$0xff]  ;;  %v66_v0 = vld [vmem:[#allocation2 + $0x110] sm:$0xff] }
  0x1a   :  { %130 = vmatpush.msra.mxu1 %v78_v38  ;;  %152 = vmatpush.msra.mxu2 %v43_v39  ;;  %v65_v60 = vld [vmem:[#allocation2 + $0x108] sm:$0xff]  ;;  %v32_v63 = vld [vmem:[#allocation2] sm:$0xff] }
  0x1b   :  { %172 = vmatpush.msra.mxu3 %v75_v40  ;;  %112 = vmatpush.msra.mxu0 %v42_v41  ;;  %v31_v62 = vld [vmem:[%s259_s0 + $0x8] sm:$0xff]  ;;  %v64_v1 = vld [vmem:[#allocation2 + $0x100] sm:$0xff] }
  0x1c   :  { %131 = vmatpush.msra.mxu1 %v76_v42  ;;  %153 = vmatpush.msra.mxu2 %v41_v43  ;;  %v96_v2 = vld [vmem:[%s261_s2] sm:$0x3] }
  0x1d   :  { %173 = vmatpush.msra.mxu3 %v73_v44  ;;  %113 = vmatpush.msra.mxu0 %v40_v45  ;;  %v98_v3 = vperm.slane %v96_v2, 0  ;;  %v99_v6 = vperm.slane %v96_v2, 1 }
  0x1e   :  { %132 = vmatpush.msra.mxu1 %v74_v46  ;;  %154 = vmatpush.msra.mxu2 %v39_v47 }
  0x1f   :  { %174 = vmatpush.msra.mxu3 %v71_v48  ;;  %114 = vmatpush.msra.mxu0 %v38_v49 }
  0x20   :  { %133 = vmatpush.msra.mxu1 %v72_v50  ;;  %155 = vmatpush.msra.mxu2 %v37_v51 }
  0x21   :  { %175 = vmatpush.msra.mxu3 %v69_v52  ;;  %115 = vmatpush.msra.mxu0 %v36_v53 }
  0x22   :  { %134 = vmatpush.msra.mxu1 %v70_v54  ;;  %156 = vmatpush.msra.mxu2 %v35_v55 }
  0x23   :  { %176 = vmatpush.msra.mxu3 %v67_v56  ;;  %116 = vmatpush.msra.mxu0 %v34_v57 }
  0x24   :  { %135 = vmatpush.msra.mxu1 %v68_v58  ;;  %157 = vmatpush.msra.mxu2 %v33_v59 }
  0x25   :  { %177 = vmatpush.msra.mxu3 %v65_v60  ;;  %158 = vmatmul.f32.vlgmr.msra.gmra.mxu2 %v30_v61 }
  0x26   :  { %178 = vmatmul.f32.vlgmr.msra.gmra.mxu3 %v31_v62  ;;  %117 = vmatpush.msra.mxu0 %v32_v63 }
  0x27   :  { %136 = vmatpush.msra.mxu1 %v66_v0  ;;  %118 = vmatmul.f32.vlgmr.msra.gmra.mxu0 %v30_v61 }
  0x29   :  { %137 = vmatpush.msra.mxu1 %v64_v1 }
  0x2a   :  { %138 = vmatmul.f32.vlgmr.msra.gmra.mxu1 %v31_v62 }
  0xa4   :  { %v119_v4 = vpop.f32.mrf.mxu0 }
  0xa5   :  { %v120_v5 = vadd.f32 %v119_v4, %v98_v3 }
  0xa7   :  { %v139_v7 = vpop.f32.mrf.mxu1 }
  0xa8   :  { %v140_v8 = vadd.f32 %v139_v7, %v120_v5  ;;  %v159_v9 = vpop.f32.mrf.mxu2 }
  0xa9   :  { %v179_v10 = vpop.f32.mrf.mxu3  ;;  %v160_v11 = vadd.f32 %v159_v9, %v99_v6 }
  0xaa   :  { %182 = vst [vmem:[%s262_s3] sm:$0xff] %v140_v8 }
  0xab   :  { %v180_v12 = vadd.f32 %v179_v10, %v160_v11 }
  0xad   :  { %183 = vst [vmem:[%s262_s3 + $0x8] sm:$0xff] %v180_v12 }
  0xae   :  { %188 = vsyncpa [#allocation3], 1 }

</bundles_post_ra>
